<compile_context>
chip_gen: v7x
topology: tpu7x:2x2x1
jax: 0.10.0
libtpu: 0.0.40
codegen_flags: <defaults>
</compile_context>

<pallas_src>
import jax
import jax.numpy as jnp
from jax.experimental import pallas as pl
from jax.experimental.pallas import tpu as pltpu


# ----------------------------------------------------------------------------
# Weight preparation ("model load" time, done once, outside the hot path).
# ----------------------------------------------------------------------------
def fold_nhwc_weights_to_nchw(w1_nhwc, C, H, W):
    """Reorder Dense-1 rows from NHWC-flatten order to NCHW-flatten order.

    Keras Flatten on an NHWC tensor indexes rows as  h*W*C + w*C + c.
    Feeding the kernel x_nchw.reshape(B, C*H*W) indexes columns as
    c*H*W + h*W + w.  Reordering W1's rows once makes the two products equal,
    eliminating the per-call activation transpose.
    """
    hidden = w1_nhwc.shape[1]
    return (
        w1_nhwc.reshape(H, W, C, hidden)
        .transpose(2, 0, 1, 3)
        .reshape(C * H * W, hidden)
    )


# ----------------------------------------------------------------------------
# Kernels
# ----------------------------------------------------------------------------
def classifier_single_kernel(x_ref, w1_ref, b1_ref, w2_ref, b2_ref, out_ref):
    """Whole problem resident in VMEM: one straight-line body, no grid."""
    h = jnp.maximum(
        jnp.dot(x_ref[...], w1_ref[...], preferred_element_type=jnp.float32)
        + b1_ref[...],
        0.0,
    )
    out_ref[...] = (
        jnp.dot(h, w2_ref[...], preferred_element_type=jnp.float32) + b2_ref[...]
    ).astype(out_ref.dtype)


def classifier_tiled_kernel(x_ref, w1_ref, b1_ref, w2_ref, b2_ref, out_ref, acc_ref):
    """Fallback for large K: grid axis 0 iterates over K-chunks (reduction)."""
    k = pl.program_id(0)

    @pl.when(k == 0)
    def _init():
        acc_ref[...] = jnp.zeros_like(acc_ref)

    acc_ref[...] += jnp.dot(
        x_ref[...], w1_ref[...], preferred_element_type=jnp.float32
    )

    @pl.when(k == pl.num_programs(0) - 1)
    def _finalize():
        h = jnp.maximum(acc_ref[...] + b1_ref[...], 0.0)
        out_ref[...] = (
            jnp.dot(h, w2_ref[...], preferred_element_type=jnp.float32)
            + b2_ref[...]
        ).astype(out_ref.dtype)


# ----------------------------------------------------------------------------
# Wrapper
# ----------------------------------------------------------------------------
def classifier_forward(
    x_nchw,
    w1_nchw,
    b1,
    w2,
    b2,
    *,
    tk=2048,
    single_shot_max_bytes=8 << 20,  # conservative: fits v5e's 16 MiB scoped VMEM
):
    """x_nchw: (B, C, H, W) f32.  w1_nchw: NCHW-flatten-ordered Dense-1 weight.

    Returns logits (B, num_classes) — no softmax (softmaxed=True path).
    """
    B, C, H, W = x_nchw.shape
    K = C * H * W
    x_flat = x_nchw.reshape(B, K)  # free reshape: NCHW is already row-major here

    hidden = w1_nchw.shape[1]
    num_classes = w2.shape[1]
    b1_2d = b1.reshape(1, hidden)
    b2_2d = b2.reshape(1, num_classes)

    itemsize = 4  # f32
    resident_bytes = (
        B * K + K * hidden + hidden + hidden * num_classes + num_classes
        + B * hidden + B * num_classes
    ) * itemsize

    if resident_bytes <= single_shot_max_bytes:
        # --- Fast path: single grid-less kernel, everything resident in VMEM.
        return pl.pallas_call(
            classifier_single_kernel,
            out_shape=jax.ShapeDtypeStruct((B, num_classes), jnp.float32),
            in_specs=[pl.BlockSpec(memory_space=pltpu.MemorySpace.VMEM)] * 5,
            out_specs=pl.BlockSpec(memory_space=pltpu.MemorySpace.VMEM),
        )(x_flat, w1_nchw, b1_2d, w2, b2_2d)

    # --- Fallback: large K -> stream x / W1 chunks over a reduction grid.
    n_k = pl.cdiv(K, tk)
    K_pad = n_k * tk
    if K_pad != K:
        # Zero-padding the contraction dim does not change the matmul result.
        x_flat = jnp.pad(x_flat, ((0, 0), (0, K_pad - K)))
        w1_nchw = jnp.pad(w1_nchw, ((0, K_pad - K), (0, 0)))

    # Explicit VMEM budget: double-buffered streamed inputs + resident tensors
    # + headroom.  Keeps the kernel portable across 16/32 MiB scoped defaults
    # (v5e / v6e / v7x) without per-chip retuning.
    streamed = 2 * (B * tk + tk * hidden) * itemsize
    small_resident = (
        hidden + num_classes + hidden * num_classes + B * num_classes + B * hidden
    ) * itemsize
    vmem_budget = max(4 << 20, streamed + small_resident + (2 << 20))

    return pl.pallas_call(
        classifier_tiled_kernel,
        out_shape=jax.ShapeDtypeStruct((B, num_classes), jnp.float32),
        grid_spec=pltpu.PrefetchScalarGridSpec(
            num_scalar_prefetch=0,
            grid=(n_k,),
            in_specs=[
                pl.BlockSpec((B, tk), lambda k: (0, k)),                 # x chunk
                pl.BlockSpec((tk, hidden), lambda k: (k, 0)),            # W1 chunk
                pl.BlockSpec((1, hidden), lambda k: (0, 0)),             # b1
                pl.BlockSpec((hidden, num_classes), lambda k: (0, 0)),   # W2
                pl.BlockSpec((1, num_classes), lambda k: (0, 0)),        # b2
            ],
            out_specs=pl.BlockSpec((B, num_classes), lambda k: (0, 0)),
            scratch_shapes=[pltpu.VMEM((B, hidden), jnp.float32)],
        ),
        compiler_params=pltpu.CompilerParams(
            dimension_semantics=("arbitrary",),  # K is a reduction axis
            vmem_limit_bytes=int(vmem_budget),
        ),
    )(x_flat, w1_nchw, b1_2d, w2, b2_2d)


# ----------------------------------------------------------------------------
# Pure-JAX reference (mirrors the original module: permute -> flatten -> MLP).
# ----------------------------------------------------------------------------
def reference_forward(x_nchw, w1_nhwc, b1, w2, b2):
    x_nhwc = jnp.transpose(x_nchw, (0, 2, 3, 1))
    x_flat = x_nhwc.reshape(x_nhwc.shape[0], -1)
    h = jnp.maximum(x_flat @ w1_nhwc + b1, 0.0)
    return h @ w2 + b2


if __name__ == "__main__":
    # Small shapes consistent with the module's NCHW input convention.
    B, C, H, W = 2, 4, 16, 16
    HIDDEN = 32
    NUM_CLASSES = 10
    K = C * H * W

    key = jax.random.PRNGKey(0)
    kx, kw1, kb1, kw2, kb2 = jax.random.split(key, 5)

    x = jax.random.normal(kx, (B, C, H, W), dtype=jnp.float32)

    # Deterministic synthetic parameters (no checkpoint loading).  W1 is defined
    # in NHWC-flatten row order, as a Keras Flatten->Dense would be.
    w1_nhwc = jax.random.normal(kw1, (K, HIDDEN), dtype=jnp.float32) * 0.05
    b1 = jax.random.normal(kb1, (HIDDEN,), dtype=jnp.float32) * 0.01
    w2 = jax.random.normal(kw2, (HIDDEN, NUM_CLASSES), dtype=jnp.float32) * 0.05
    b2 = jax.random.normal(kb2, (NUM_CLASSES,), dtype=jnp.float32) * 0.01

    # One-time "model load" step: fold the NCHW->NHWC permute into W1.
    w1_nchw = jax.block_until_ready(fold_nhwc_weights_to_nchw(w1_nhwc, C, H, W))

    ref = reference_forward(x, w1_nhwc, b1, w2, b2)

    # Fast path: single-shot, grid-less kernel.
    logits = classifier_forward(x, w1_nchw, b1, w2, b2)
    logits = jax.block_until_ready(logits)
    assert logits.shape == (B, NUM_CLASSES)
    assert jnp.allclose(logits, ref, atol=1e-4, rtol=1e-4), "single-shot mismatch"

    # Fallback path: force the tiled K-reduction kernel (large-K code path).
    logits_tiled = classifier_forward(
        x, w1_nchw, b1, w2, b2, single_shot_max_bytes=0, tk=256
    )
    logits_tiled = jax.block_until_ready(logits_tiled)
    assert jnp.allclose(logits_tiled, ref, atol=1e-4, rtol=1e-4), "tiled mismatch"

    # TODO(synk): TFEngine's TF-gradient-tape backward pass has no Pallas
    # equivalent here; only the forward (logits) path is implemented.
    print("KERNEL_OK")
</pallas_src>

<mosaic_0001>
module attributes {stable_mosaic.version = 11 : i64} {
  func.func @classifier_single_kernel(%arg0: memref<2x1024xf32, #tpu.memory_space<vmem>>, %arg1: memref<1024x32xf32, #tpu.memory_space<vmem>>, %arg2: memref<1x32xf32, #tpu.memory_space<vmem>>, %arg3: memref<32x10xf32, #tpu.memory_space<vmem>>, %arg4: memref<1x10xf32, #tpu.memory_space<vmem>>, %arg5: memref<2x10xf32, #tpu.memory_space<vmem>>) attributes {dimension_semantics = [], scalar_prefetch = 0 : i64, scratch_operands = 0 : i64, tpu.core_type = #tpu.core_type<tc>} {
    %c0 = arith.constant 0 : index
    %c0_0 = arith.constant 0 : index
    %0 = vector.load %arg0[%c0, %c0_0] : memref<2x1024xf32, #tpu.memory_space<vmem>>, vector<2x1024xf32>
    %c0_1 = arith.constant 0 : index
    %c0_2 = arith.constant 0 : index
    %1 = vector.load %arg1[%c0_1, %c0_2] : memref<1024x32xf32, #tpu.memory_space<vmem>>, vector<1024x32xf32>
    %cst = arith.constant dense<0.000000e+00> : vector<2x32xf32>
    %2 = tpu.matmul %0, %1, %cst {dimension_numbers = #tpu.dot_dimension_numbers<[1], [0], [0], [1], [0, 0, 1, 1], [], []>} : vector<2x1024xf32>, vector<1024x32xf32>, vector<2x32xf32> -> vector<2x32xf32>
    %c0_3 = arith.constant 0 : index
    %c0_4 = arith.constant 0 : index
    %3 = vector.load %arg2[%c0_3, %c0_4] : memref<1x32xf32, #tpu.memory_space<vmem>>, vector<1x32xf32>
    %4 = vector.broadcast %3 : vector<1x32xf32> to vector<2x32xf32>
    %5 = arith.addf %2, %4 : vector<2x32xf32>
    %cst_5 = arith.constant 0.000000e+00 : f32
    %6 = vector.broadcast %cst_5 : f32 to vector<2x32xf32>
    %7 = arith.maximumf %5, %6 : vector<2x32xf32>
    %c0_6 = arith.constant 0 : index
    %c0_7 = arith.constant 0 : index
    %8 = vector.load %arg3[%c0_6, %c0_7] : memref<32x10xf32, #tpu.memory_space<vmem>>, vector<32x10xf32>
    %cst_8 = arith.constant dense<0.000000e+00> : vector<2x10xf32>
    %9 = tpu.matmul %7, %8, %cst_8 {dimension_numbers = #tpu.dot_dimension_numbers<[1], [0], [0], [1], [0, 0, 1, 1], [], []>} : vector<2x32xf32>, vector<32x10xf32>, vector<2x10xf32> -> vector<2x10xf32>
    %c0_9 = arith.constant 0 : index
    %c0_10 = arith.constant 0 : index
    %10 = vector.load %arg4[%c0_9, %c0_10] : memref<1x10xf32, #tpu.memory_space<vmem>>, vector<1x10xf32>
    %11 = vector.broadcast %10 : vector<1x10xf32> to vector<2x10xf32>
    %12 = arith.addf %9, %11 : vector<2x10xf32>
    %c0_11 = arith.constant 0 : index
    %c0_12 = arith.constant 0 : index
    %13 = vector.load %arg5[%c0_11, %c0_12] : memref<2x10xf32, #tpu.memory_space<vmem>>, vector<2x10xf32>
    tpu.vector_store %arg5[%c0_11, %c0_12], %12 {strides = array<i32>} : memref<2x10xf32, #tpu.memory_space<vmem>>, vector<2x10xf32>,
    return
  }
}

</mosaic_0001>

<bundles_post_ra>
// kernel: tpu_custom_call.1
= control target key start
LH: loop header
LB: loop body
LE: loop exit
PB: predicated region body
PF: predicated region fallthrough
CT: control target
= control target key end

     0   :  { %v908_v47 = vmov 1983009808   ;;  %v164_v49 = vlaneseq  ;;  %s1374_s0 = inlined_call_operand.vmem [shape: f32[2,1024], index: 0, kind: input, shape index: {}]   ;;  %s1375_s1 = inlined_call_operand.vmem [shape: f32[1024,32], index: 1, kind: input, shape index: {}]   ;;  %s1376_s2 = inlined_call_operand.vmem [shape: f32[1,32], index: 2, kind: input, shape index: {}]   ;;  %s1377_s3 = inlined_call_operand.vmem [shape: f32[32,10], index: 3, kind: input, shape index: {}]   ;;  %s1378_s4 = inlined_call_operand.vmem [shape: f32[1,10], index: 4, kind: input, shape index: {}]   ;;  %s1379_s5 = inlined_call_operand.hbm [shape: f32[2,10], index: 5, kind: output, shape index: {}]  }
   0x1   :  { %v39_v0 = vld [vmem:[%s1375_s1 + $0x80] sm:$0xff]  ;;  %v40_v1 = vld [vmem:[%s1375_s1 + $0x88] sm:$0xff]  ;;  %v41_v11 = vld [vmem:[%s1375_s1 + $0x90] sm:$0xff]  ;;  %v162_v48 = vunpack.c.l.s4 %v908_v47 }
   0x2   :  { %v23_v2 = vld [vmem:[%s1375_s1] sm:$0xff]  ;;  %v743_v3 = vpack.c.bf16 %v40_v1, %v39_v0  ;;  %v24_v4 = vld [vmem:[%s1375_s1 + $0x8] sm:$0xff]  ;;  %v42_v13 = vld [vmem:[%s1375_s1 + $0x98] sm:$0xff]  ;;  %v165_v0 = vshrl.u32 %v164_v49, 7 }
   0x3   :  { %v71_v5 = vld [vmem:[%s1375_s1 + $0x180] sm:$0xff]  ;;  %v72_v6 = vld [vmem:[%s1375_s1 + $0x188] sm:$0xff]  ;;  %v745_v7 = vpack.c.bf16 %v24_v4, %v23_v2  ;;  %v25_v14 = vld [vmem:[%s1375_s1 + $0x10] sm:$0xff]  ;;  %v747_v16 = vpack.c.bf16 %v42_v13, %v41_v11  ;;  %v163_v63 = vunpack.c.0.s8 %v162_v48 }
   0x4   :  { %v775_v8 = vpack.c.bf16 %v72_v6, %v71_v5  ;;  %v55_v9 = vld [vmem:[%s1375_s1 + $0x100] sm:$0xff]  ;;  %v56_v10 = vld [vmem:[%s1375_s1 + $0x108] sm:$0xff]  ;;  %744 = vmatprep.subr.bf16.mxu0 %v743_v3  ;;  %v26_v15 = vld [vmem:[%s1375_s1 + $0x18] sm:$0xff] }
   0x5   :  { %v777_v12 = vpack.c.bf16 %v56_v10, %v55_v9  ;;  %746 = vmatpush3.bf16.msra.mxu0 %v745_v7  ;;  %v749_v17 = vpack.c.bf16 %v26_v15, %v25_v14  ;;  %v73_v18 = vld [vmem:[%s1375_s1 + $0x190] sm:$0xff]  ;;  %v74_v19 = vld [vmem:[%s1375_s1 + $0x198] sm:$0xff]  ;;  %v43_v23 = vld [vmem:[%s1375_s1 + $0xa0] sm:$0xff]  ;;  %v1093_v13 = vsub.s32 %v163_v63, %v165_v0 }
   0x6   :  { %776 = vmatprep.subr.bf16.mxu1 %v775_v8  ;;  %v57_v20 = vld [vmem:[%s1375_s1 + $0x110] sm:$0xff]  ;;  %v779_v21 = vpack.c.bf16 %v74_v19, %v73_v18  ;;  %v58_v22 = vld [vmem:[%s1375_s1 + $0x118] sm:$0xff]  ;;  %v44_v24 = vld [vmem:[%s1375_s1 + $0xa8] sm:$0xff]  ;;  %748 = vmatprep.subr.bf16.mxu0 %v747_v16 }
   0x7   :  { %778 = vmatpush3.bf16.msra.mxu1 %v777_v12  ;;  %v781_v25 = vpack.c.bf16 %v58_v22, %v57_v20  ;;  %v751_v26 = vpack.c.bf16 %v44_v24, %v43_v23  ;;  %v27_v27 = vld [vmem:[%s1375_s1 + $0x20] sm:$0xff]  ;;  %v28_v28 = vld [vmem:[%s1375_s1 + $0x28] sm:$0xff]  ;;  %v45_v35 = vld [vmem:[%s1375_s1 + $0xb0] sm:$0xff] }
   0x8   :  { %v75_v29 = vld [vmem:[%s1375_s1 + $0x1a0] sm:$0xff]  ;;  %780 = vmatprep.subr.bf16.mxu1 %v779_v21  ;;  %v76_v30 = vld [vmem:[%s1375_s1 + $0x1a8] sm:$0xff]  ;;  %v753_v33 = vpack.c.bf16 %v28_v28, %v27_v27  ;;  %v46_v36 = vld [vmem:[%s1375_s1 + $0xb8] sm:$0xff] }
   0x9   :  { %v59_v31 = vld [vmem:[%s1375_s1 + $0x120] sm:$0xff]  ;;  %v60_v32 = vld [vmem:[%s1375_s1 + $0x128] sm:$0xff]  ;;  %750 = vmatpush3.bf16.msra.mxu0 %v749_v17  ;;  %v783_v34 = vpack.c.bf16 %v76_v30, %v75_v29  ;;  %v29_v37 = vld [vmem:[%s1375_s1 + $0x30] sm:$0xff]  ;;  %v755_v39 = vpack.c.bf16 %v46_v36, %v45_v35 }
   0xa   :  { %752 = vmatprep.subr.bf16.mxu0 %v751_v26  ;;  %v785_v38 = vpack.c.bf16 %v60_v32, %v59_v31  ;;  %v30_v40 = vld [vmem:[%s1375_s1 + $0x38] sm:$0xff]  ;;  %v77_v41 = vld [vmem:[%s1375_s1 + $0x1b0] sm:$0xff]  ;;  %v47_v46 = vld [vmem:[%s1375_s1 + $0xc0] sm:$0xff] }
   0xb   :  { %782 = vmatpush3.bf16.msra.mxu1 %v781_v25  ;;  %v78_v42 = vld [vmem:[%s1375_s1 + $0x1b8] sm:$0xff]  ;;  %v61_v44 = vld [vmem:[%s1375_s1 + $0x130] sm:$0xff]  ;;  %v48_v50 = vld [vmem:[%s1375_s1 + $0xc8] sm:$0xff]  ;;  %v757_v51 = vpack.c.bf16 %v30_v40, %v29_v37 }
   0xc   :  { %784 = vmatprep.subr.bf16.mxu1 %v783_v34  ;;  %v787_v43 = vpack.c.bf16 %v78_v42, %v77_v41  ;;  %v62_v45 = vld [vmem:[%s1375_s1 + $0x138] sm:$0xff]  ;;  %v79_v52 = vld [vmem:[%s1375_s1 + $0x1c0] sm:$0xff]  ;;  %v80_v53 = vld [vmem:[%s1375_s1 + $0x1c8] sm:$0xff]  ;;  %v759_v55 = vpack.c.bf16 %v48_v50, %v47_v46 }
   0xd   :  { %754 = vmatpush3.bf16.msra.mxu0 %v753_v33  ;;  %v789_v54 = vpack.c.bf16 %v62_v45, %v61_v44  ;;  %v31_v56 = vld [vmem:[%s1375_s1 + $0x40] sm:$0xff]  ;;  %v32_v57 = vld [vmem:[%s1375_s1 + $0x48] sm:$0xff]  ;;  %v791_v59 = vpack.c.bf16 %v80_v53, %v79_v52  ;;  %v49_v61 = vld [vmem:[%s1375_s1 + $0xd0] sm:$0xff] }
   0xe   :  { %756 = vmatprep.subr.bf16.mxu0 %v755_v39  ;;  %v63_v58 = vld [vmem:[%s1375_s1 + $0x140] sm:$0xff]  ;;  %v64_v60 = vld [vmem:[%s1375_s1 + $0x148] sm:$0xff]  ;;  %v50_v62 = vld [vmem:[%s1375_s1 + $0xd8] sm:$0xff]  ;;  %v761_v3 = vpack.c.bf16 %v32_v57, %v31_v56 }
   0xf   :  { %786 = vmatpush3.bf16.msra.mxu1 %v785_v38  ;;  %v81_v1 = vld [vmem:[%s1375_s1 + $0x1d0] sm:$0xff]  ;;  %v82_v2 = vld [vmem:[%s1375_s1 + $0x1d8] sm:$0xff]  ;;  %v793_v4 = vpack.c.bf16 %v64_v60, %v63_v58  ;;  %v763_v5 = vpack.c.bf16 %v50_v62, %v49_v61  ;;  %v51_v11 = vld [vmem:[%s1375_s1 + $0xe0] sm:$0xff] }
  0x10   :  { %788 = vmatprep.subr.bf16.mxu1 %v787_v43  ;;  %v33_v6 = vld [vmem:[%s1375_s1 + $0x50] sm:$0xff]  ;;  %v34_v7 = vld [vmem:[%s1375_s1 + $0x58] sm:$0xff]  ;;  %v795_v9 = vpack.c.bf16 %v82_v2, %v81_v1  ;;  %v52_v12 = vld [vmem:[%s1375_s1 + $0xe8] sm:$0xff] }
  0x11   :  { %758 = vmatpush3.bf16.msra.mxu0 %v757_v51  ;;  %v65_v8 = vld [vmem:[%s1375_s1 + $0x150] sm:$0xff]  ;;  %v66_v10 = vld [vmem:[%s1375_s1 + $0x158] sm:$0xff]  ;;  %v83_v14 = vld [vmem:[%s1375_s1 + $0x1e0] sm:$0xff]  ;;  %v765_v16 = vpack.c.bf16 %v34_v7, %v33_v6  ;;  %v767_v19 = vpack.c.bf16 %v52_v12, %v51_v11 }
  0x12   :  { %760 = vmatprep.subr.bf16.mxu0 %v759_v55  ;;  %v84_v15 = vld [vmem:[%s1375_s1 + $0x1e8] sm:$0xff]  ;;  %v35_v17 = vld [vmem:[%s1375_s1 + $0x60] sm:$0xff]  ;;  %v797_v18 = vpack.c.bf16 %v66_v10, %v65_v8  ;;  %v53_v25 = vld [vmem:[%s1375_s1 + $0xf0] sm:$0xff] }
  0x13   :  { %790 = vmatpush3.bf16.msra.mxu1 %v789_v54  ;;  %v36_v20 = vld [vmem:[%s1375_s1 + $0x68] sm:$0xff]  ;;  %v67_v21 = vld [vmem:[%s1375_s1 + $0x160] sm:$0xff]  ;;  %v799_v23 = vpack.c.bf16 %v84_v15, %v83_v14  ;;  %v54_v26 = vld [vmem:[%s1375_s1 + $0xf8] sm:$0xff] }
  0x14   :  { %792 = vmatprep.subr.bf16.mxu1 %v791_v59  ;;  %v21_v22 = vld [vmem:[%s1374_s0] sm:$0xff]  ;;  %v68_v24 = vld [vmem:[%s1375_s1 + $0x168] sm:$0xff]  ;;  %v85_v29 = vld [vmem:[%s1375_s1 + $0x1f0] sm:$0xff]  ;;  %v769_v31 = vpack.c.bf16 %v36_v20, %v35_v17  ;;  %v771_v35 = vpack.c.bf16 %v54_v26, %v53_v25 }
  0x15   :  { %762 = vmatpush3.bf16.msra.mxu0 %v761_v3  ;;  %v167_v27 = vrot.slane %v21_v22, %v1093_v13  ;;  %v160_v28 = vcombine.high %v21_v22, %v21_v22  ;;  %v86_v30 = vld [vmem:[%s1375_s1 + $0x1f8] sm:$0xff]  ;;  %v801_v34 = vpack.c.bf16 %v68_v24, %v67_v21  ;;  %v37_v36 = vld [vmem:[%s1375_s1 + $0x70] sm:$0xff]  ;;  %v103_v41 = vld [vmem:[%s1375_s1 + $0x280] sm:$0xff] }
  0x16   :  { %764 = vmatprep.subr.bf16.mxu0 %v763_v5  ;;  %v38_v37 = vld [vmem:[%s1375_s1 + $0x78] sm:$0xff]  ;;  %v69_v38 = vld [vmem:[%s1375_s1 + $0x170] sm:$0xff]  ;;  %v803_v39 = vpack.c.bf16 %v86_v30, %v85_v29  ;;  %v104_v42 = vld [vmem:[%s1375_s1 + $0x288] sm:$0xff] }
  0x17   :  { %794 = vmatpush3.bf16.msra.mxu1 %v793_v4  ;;  %v175_v32 = vcombine.high %v167_v27, %v167_v27  ;;  %v174_v33 = vrot.slane %v160_v28, %v1093_v13  ;;  %v70_v40 = vld [vmem:[%s1375_s1 + $0x178] sm:$0xff]  ;;  %v135_v44 = vld [vmem:[%s1375_s1 + $0x380] sm:$0xff]  ;;  %v136_v45 = vld [vmem:[%s1375_s1 + $0x388] sm:$0xff]  ;;  %v773_v46 = vpack.c.bf16 %v38_v37, %v37_v36  ;;  %v807_v48 = vpack.c.bf16 %v104_v42, %v103_v41 }
  0x18   :  { %796 = vmatprep.subr.bf16.mxu1 %v795_v9  ;;  %v805_v47 = vpack.c.bf16 %v70_v40, %v69_v38  ;;  %v87_v49 = vld [vmem:[%s1375_s1 + $0x200] sm:$0xff]  ;;  %v88_v50 = vld [vmem:[%s1375_s1 + $0x208] sm:$0xff]  ;;  %v839_v52 = vpack.c.bf16 %v136_v45, %v135_v44  ;;  %v105_v54 = vld [vmem:[%s1375_s1 + $0x290] sm:$0xff] }
  0x19   :  { %766 = vmatpush3.bf16.msra.mxu0 %v765_v16  ;;  %266 = vmatprep.mubr.f32.mxu0 %v175_v32  ;;  %v176_v43 = vcombine.high %v174_v33, %v174_v33  ;;  %v119_v51 = vld [vmem:[%s1375_s1 + $0x300] sm:$0xff]  ;;  %v120_v53 = vld [vmem:[%s1375_s1 + $0x308] sm:$0xff]  ;;  %v106_v55 = vld [vmem:[%s1375_s1 + $0x298] sm:$0xff]  ;;  %v809_v58 = vpack.c.bf16 %v88_v50, %v87_v49 }
  0x1a   :  { %768 = vmatprep.subr.bf16.mxu0 %v767_v19  ;;  %v137_v56 = vld [vmem:[%s1375_s1 + $0x390] sm:$0xff]  ;;  %v138_v57 = vld [vmem:[%s1375_s1 + $0x398] sm:$0xff]  ;;  %v841_v59 = vpack.c.bf16 %v120_v53, %v119_v51  ;;  %v811_v60 = vpack.c.bf16 %v106_v55, %v105_v54  ;;  %v107_v2 = vld [vmem:[%s1375_s1 + $0x2a0] sm:$0xff] }
  0x1b   :  { %798 = vmatpush3.bf16.msra.mxu1 %v797_v18  ;;  %336 = vmatprep.mubr.f32.mxu1 %v176_v43  ;;  %v89_v61 = vld [vmem:[%s1375_s1 + $0x210] sm:$0xff]  ;;  %v90_v62 = vld [vmem:[%s1375_s1 + $0x218] sm:$0xff]  ;;  %v843_v0 = vpack.c.bf16 %v138_v57, %v137_v56  ;;  %v108_v3 = vld [vmem:[%s1375_s1 + $0x2a8] sm:$0xff] }
  0x1c   :  { %800 = vmatprep.subr.bf16.mxu1 %v799_v23  ;;  %v121_v63 = vld [vmem:[%s1375_s1 + $0x310] sm:$0xff]  ;;  %v122_v1 = vld [vmem:[%s1375_s1 + $0x318] sm:$0xff]  ;;  %v139_v4 = vld [vmem:[%s1375_s1 + $0x3a0] sm:$0xff]  ;;  %v813_v6 = vpack.c.bf16 %v90_v62, %v89_v61  ;;  %v815_v8 = vpack.c.bf16 %v108_v3, %v107_v2 }
  0x1d   :  { %770 = vmatpush3.bf16.msra.mxu0 %v769_v31  ;;  %v140_v5 = vld [vmem:[%s1375_s1 + $0x3a8] sm:$0xff]  ;;  %v845_v7 = vpack.c.bf16 %v122_v1, %v121_v63  ;;  %v91_v9 = vld [vmem:[%s1375_s1 + $0x220] sm:$0xff]  ;;  %v109_v15 = vld [vmem:[%s1375_s1 + $0x2b0] sm:$0xff] }
  0x1e   :  { %772 = vmatprep.subr.bf16.mxu0 %v771_v35  ;;  %v92_v10 = vld [vmem:[%s1375_s1 + $0x228] sm:$0xff]  ;;  %v123_v11 = vld [vmem:[%s1375_s1 + $0x320] sm:$0xff]  ;;  %v847_v12 = vpack.c.bf16 %v140_v5, %v139_v4  ;;  %v110_v16 = vld [vmem:[%s1375_s1 + $0x2b8] sm:$0xff] }
  0x1f   :  { %802 = vmatpush3.bf16.msra.mxu1 %v801_v34  ;;  %v124_v14 = vld [vmem:[%s1375_s1 + $0x328] sm:$0xff]  ;;  %v141_v17 = vld [vmem:[%s1375_s1 + $0x3b0] sm:$0xff]  ;;  %v142_v18 = vld [vmem:[%s1375_s1 + $0x3b8] sm:$0xff]  ;;  %v817_v19 = vpack.c.bf16 %v92_v10, %v91_v9  ;;  %v819_v22 = vpack.c.bf16 %v110_v16, %v109_v15 }
  0x20   :  { %804 = vmatprep.subr.bf16.mxu1 %v803_v39  ;;  %v93_v20 = vld [vmem:[%s1375_s1 + $0x230] sm:$0xff]  ;;  %v849_v21 = vpack.c.bf16 %v124_v14, %v123_v11  ;;  %v94_v23 = vld [vmem:[%s1375_s1 + $0x238] sm:$0xff]  ;;  %v851_v26 = vpack.c.bf16 %v142_v18, %v141_v17  ;;  %v112_v28 = vld [vmem:[%s1375_s1 + $0x2c8] sm:$0xff] }
  0x21   :  { %774 = vmatpush3.bf16.msra.mxu0 %v773_v46  ;;  %v125_v24 = vld [vmem:[%s1375_s1 + $0x330] sm:$0xff]  ;;  %v126_v25 = vld [vmem:[%s1375_s1 + $0x338] sm:$0xff]  ;;  %v143_v29 = vld [vmem:[%s1375_s1 + $0x3c0] sm:$0xff] }
  0x22   :  { %808 = vmatprep.subr.bf16.mxu0 %v807_v48  ;;  %v144_v30 = vld [vmem:[%s1375_s1 + $0x3c8] sm:$0xff] }
  0x23   :  { %806 = vmatpush3.bf16.msra.mxu1 %v805_v47  ;;  %v22_v31 = vld [vmem:[%s1374_s0 + $0x8] sm:$0xff] }
  0x24   :  { %840 = vmatprep.subr.bf16.mxu1 %v839_v52  ;;  %267 = vmatmul.mubr.f32.vlgmr.msra.gmra.mrb[0].mxu0 %v167_v27  ;;  %v111_v27 = vld [vmem:[%s1375_s1 + $0x2c0] sm:$0xff] }
  0x25   :  { %810 = vmatpush3.bf16.msra.mxu0 %v809_v58 }
  0x26   :  { %337 = vmatmul.mubr.f32.vlgmr.msra.gmra.mrb[0].mxu1 %v174_v33  ;;  %812 = vmatprep.subr.bf16.mxu0 %v811_v60 }
  0x27   :  { %842 = vmatpush3.bf16.msra.mxu1 %v841_v59 }
  0x28   :  { %844 = vmatprep.subr.bf16.mxu1 %v843_v0 }
  0x29   :  { %814 = vmatpush3.bf16.msra.mxu0 %v813_v6 }
  0x2a   :  { %816 = vmatprep.subr.bf16.mxu0 %v815_v8 }
  0x2b   :  { %846 = vmatpush3.bf16.msra.mxu1 %v845_v7 }
  0x2c   :  { %848 = vmatprep.subr.bf16.mxu1 %v847_v12 }
  0x2d   :  { %10 = vsyncpa [#allocation3], 0  ;;  %818 = vmatpush3.bf16.msra.mxu0 %v817_v19  ;;  %v821_v32 = vpack.c.bf16 %v94_v23, %v93_v20  ;;  %v1254_v33 = vrot.slane %v22_v31, %v1093_v13  ;;  %v177_v34 = vcombine.high %v22_v31, %v22_v31  ;;  %v853_v35 = vpack.c.bf16 %v126_v25, %v125_v24  ;;  %v95_v37 = vld [vmem:[%s1375_s1 + $0x240] sm:$0xff]  ;;  %v96_v38 = vld [vmem:[%s1375_s1 + $0x248] sm:$0xff]  ;;  %s912_s9 = smov [#allocation2]  }
  0x2e   :  { %820 = vmatprep.subr.bf16.mxu0 %v819_v22  ;;  %v823_v36 = vpack.c.bf16 %v112_v28, %v111_v27  ;;  %v127_v39 = vld [vmem:[%s1375_s1 + $0x340] sm:$0xff]  ;;  %v855_v40 = vpack.c.bf16 %v144_v30, %v143_v29  ;;  %v128_v41 = vld [vmem:[%s1375_s1 + $0x348] sm:$0xff]  ;;  %v113_v42 = vld [vmem:[%s1375_s1 + $0x2d0] sm:$0xff]  ;;  %v825_v48 = vpack.c.bf16 %v96_v38, %v95_v37  ;;  %v909_v22 = vmov 0.0|0.0   ;;  %s576_s10 = sshll.u32 %s912_s9, 4  ;;  %s577_s10 = int_to_ptr.vmem [resolvable:$true] %s576_s10 }
  0x2f   :  { %850 = vmatpush3.bf16.msra.mxu1 %v849_v21  ;;  %v114_v43 = vld [vmem:[%s1375_s1 + $0x2d8] sm:$0xff]  ;;  %v192_v44 = vcombine.high %v1254_v33, %v1254_v33  ;;  %v191_v45 = vrot.slane %v177_v34, %v1093_v13  ;;  %v145_v46 = vld [vmem:[%s1375_s1 + $0x3d0] sm:$0xff]  ;;  %v857_v50 = vpack.c.bf16 %v128_v41, %v127_v39  ;;  %v115_v56 = vld [vmem:[%s1375_s1 + $0x2e0] sm:$0xff]  ;;  %vm910_vm0 = vmmov 0   ;;  %s884_s11 = scalar_lea.vmem %s577_s10, 32  ;;  %p889_p1 = scmp.lt.s32.totalorder %s577_s10, %s577_s10 }
  0x30   :  { %852 = vmatprep.subr.bf16.mxu1 %v851_v26  ;;  %v146_v47 = vld [vmem:[%s1375_s1 + $0x3d8] sm:$0xff]  ;;  %v827_v51 = vpack.c.bf16 %v114_v43, %v113_v42  ;;  %v97_v13 = vld [vmem:[%s1375_s1 + $0x250] sm:$0xff]  ;;  %v116_v57 = vld [vmem:[%s1375_s1 + $0x2e8] sm:$0xff]  ;;  %v911_v26 = vmov 0.0   ;;  %vm494_vm1 = vcmask 261120   ;;  %vm568_vm2 = vcmask 74752   ;;  %p885_p0 = scmp.ne.s32.totalorder %s577_s10, %s884_s11  ;;  %p890_p2 = scmp.lt.s32.totalorder %s884_s11, %s884_s11 }
  0x31   :  { %822 = vmatpush3.bf16.msra.mxu0 %v821_v32  ;;  %406 = vmatprep.mubr.f32.mxu0 %v192_v44  ;;  %v193_v49 = vcombine.high %v191_v45, %v191_v45  ;;  %v98_v52 = vld [vmem:[%s1375_s1 + $0x258] sm:$0xff]  ;;  %v129_v53 = vld [vmem:[%s1375_s1 + $0x350] sm:$0xff]  ;;  %v859_v54 = vpack.c.bf16 %v146_v47, %v145_v46  ;;  %v147_v58 = vld [vmem:[%s1375_s1 + $0x3e0] sm:$0xff]  ;;  %v831_v62 = vpack.c.bf16 %v116_v57, %v115_v56 }
  0x32   :  { %824 = vmatprep.subr.bf16.mxu0 %v823_v36  ;;  %v130_v55 = vld [vmem:[%s1375_s1 + $0x358] sm:$0xff]  ;;  %v148_v59 = vld [vmem:[%s1375_s1 + $0x3e8] sm:$0xff]  ;;  %v829_v60 = vpack.c.bf16 %v98_v52, %v97_v13  ;;  %v99_v63 = vld [vmem:[%s1375_s1 + $0x260] sm:$0xff]  ;;  %p891_p3 = por %p890_p2, %p889_p1 }
  0x33   :  { %854 = vmatpush3.bf16.msra.mxu1 %v853_v35  ;;  %476 = vmatprep.mubr.f32.mxu1 %v193_v49  ;;  %v861_v61 = vpack.c.bf16 %v130_v55, %v129_v53  ;;  %v100_v0 = vld [vmem:[%s1375_s1 + $0x268] sm:$0xff]  ;;  %v131_v1 = vld [vmem:[%s1375_s1 + $0x360] sm:$0xff]  ;;  %v863_v2 = vpack.c.bf16 %v148_v59, %v147_v58  ;;  %v117_v4 = vld [vmem:[%s1375_s1 + $0x2f0] sm:$0xff] }
  0x34   :  { %856 = vmatprep.subr.bf16.mxu1 %v855_v40  ;;  %v132_v3 = vld [vmem:[%s1375_s1 + $0x368] sm:$0xff]  ;;  %v118_v5 = vld [vmem:[%s1375_s1 + $0x2f8] sm:$0xff]  ;;  %v149_v6 = vld [vmem:[%s1375_s1 + $0x3f0] sm:$0xff]  ;;  %v833_v8 = vpack.c.bf16 %v100_v0, %v99_v63  ;;  %p892_p4 = pnand %p891_p3, %p885_p0 }
  0x35   :  { %826 = vmatpush3.bf16.msra.mxu0 %v825_v48  ;;  %v150_v7 = vld [vmem:[%s1375_s1 + $0x3f8] sm:$0xff]  ;;  %v865_v9 = vpack.c.bf16 %v132_v3, %v131_v1  ;;  %v835_v10 = vpack.c.bf16 %v118_v5, %v117_v4  ;;  %v101_v11 = vld [vmem:[%s1375_s1 + $0x270] sm:$0xff]  ;;  %v483_v19 = vld [vmem:[%s1377_s3] sm:$0xff] }
  0x36   :  { %828 = vmatprep.subr.bf16.mxu0 %v827_v51  ;;  %v102_v12 = vld [vmem:[%s1375_s1 + $0x278] sm:$0xff]  ;;  %v867_v14 = vpack.c.bf16 %v150_v7, %v149_v6  ;;  %v133_v15 = vld [vmem:[%s1375_s1 + $0x370] sm:$0xff]  ;;  %v484_v20 = vld [vmem:[%s1377_s3 + $0x8] sm:$0xff] }
  0x37   :  { %858 = vmatpush3.bf16.msra.mxu1 %v857_v50  ;;  %v134_v16 = vld [vmem:[%s1375_s1 + $0x378] sm:$0xff]  ;;  %v837_v17 = vpack.c.bf16 %v102_v12, %v101_v11  ;;  %v872_v21 = vpack.c.bf16 %v484_v20, %v483_v19  ;;  %v485_v23 = vld [vmem:[%s1377_s3 + $0x10] sm:$0xff]  ;;  %v584_v28 = vld [vmem:[%s1376_s2] ss:$0 sm:$0xff] }
  0x38   :  { %860 = vmatprep.subr.bf16.mxu1 %v859_v54  ;;  %v869_v18 = vpack.c.bf16 %v134_v16, %v133_v15  ;;  %v486_v24 = vld [vmem:[%s1377_s3 + $0x18] sm:$0xff] }
  0x39   :  { %830 = vmatpush3.bf16.msra.mxu0 %v829_v60  ;;  %v875_v25 = vpack.c.bf16 %v486_v24, %v485_v23 }
  0x3a   :  { %832 = vmatprep.subr.bf16.mxu0 %v831_v62 }
  0x3b   :  { %862 = vmatpush3.bf16.msra.mxu1 %v861_v61 }
  0x3c   :  { %864 = vmatprep.subr.bf16.mxu1 %v863_v2 }
  0x3d   :  { %834 = vmatpush3.bf16.msra.mxu0 %v833_v8 }
  0x3e   :  { %836 = vmatprep.subr.bf16.mxu0 %v835_v10 }
  0x3f   :  { %866 = vmatpush3.bf16.msra.mxu1 %v865_v9 }
  0x40   :  { %868 = vmatprep.subr.bf16.mxu1 %v867_v14 }
  0x41   :  { %838 = vmatpush3.bf16.msra.mxu0 %v837_v17 }
  0x42   :  { %871 = vmatprep.subr.bf16.mxu0 %v909_v22 }
  0x43   :  { %870 = vmatpush3.bf16.msra.mxu1 %v869_v18 }
  0x44   :  { %407 = vmatmul.mubr.f32.vlgmr.msra.gmra.mrb[2].mxu0 %v1254_v33 }
  0x45   :  { %873 = vmatpush3.bf16.msra.mxu0 %v872_v21  ;;  %740 = vmatprep.mubr.msk.f32.mxu0 %vm910_vm0, %v911_v26 }
  0x46   :  { %477 = vmatmul.mubr.f32.vlgmr.msra.gmra.mrb[2].mxu1 %v191_v45  ;;  %874 = vmatprep.subr.bf16.mxu0 %v909_v22  ;;  %v585_v45 = vld [vmem:[%s1378_s4] ss:$0 sm:$0xff] }
  0x49   :  { %876 = vmatpush3.bf16.msra.mxu0 %v875_v25 }
  0xf7   :  { %v619_v27 = vpop.f32.mrb[0].mxu0 }
  0xf8   :  { %v620_v29 = vpop.f32.mrb[1].mxu0 }
  0xf9   :  { %v654_v30 = vpop.f32.mrb[0].mxu1  ;;  %v621_v31 = vadd.f32 %v620_v29, %v619_v27 }
  0xfa   :  { %v655_v32 = vpop.f32.mrb[1].mxu1 }
  0xfb   :  { %v656_v33 = vadd.f32 %v655_v32, %v654_v30  ;;  %v269_v34 = vadd.f32 %v621_v31, %v584_v28 }
  0xfd   :  { %v339_v35 = vadd.f32 %v656_v33, %v269_v34 }
 0x117   :  { %v689_v36 = vpop.f32.mrb[2].mxu0 }
 0x118   :  { %v690_v37 = vpop.f32.mrb[3].mxu0 }
 0x119   :  { %v724_v38 = vpop.f32.mrb[2].mxu1  ;;  %v691_v39 = vadd.f32 %v690_v37, %v689_v36 }
 0x11a   :  { %v725_v40 = vpop.f32.mrb[3].mxu1 }
 0x11b   :  { %v726_v41 = vadd.f32 %v725_v40, %v724_v38  ;;  %v409_v42 = vadd.f32 %v691_v39, %v339_v35 }
 0x11d   :  { %v479_v43 = vadd.f32 %v726_v41, %v409_v42 }
 0x11f   :  { %v482_v44 = vmax.f32 %v479_v43, 0.0 }
 0x121   :  { %741 = vmatmul.mubr.msk.f32.vlgmr.msra.gmra.mrb[4].mxu0 %vm494_vm1, %v482_v44 }
 0x1f4   :  { %v564_v46 = vpop.f32.mrb[4].mxu0 }
 0x1f5   :  { %v565_v47 = vadd.f32 %v585_v45, %v564_v46  ;;  %v742_v48 = vpop.f32.mrb[5].mxu0 }
 0x1f7   :  { %569 = vst.msk [vmem:[#allocation2] sm:$0x3] %vm568_vm2, %v565_v47 }
 0x1f8   :  { %895 = shalt.err (!%p892_p4)
}
 0x1f9   :  { %s896_s14 = scalar_lea.hbm %s1379_s5, 32 }
 0x1fa   :  { %p897_p5 = scmp.ne.s32.totalorder %s1379_s5, %s896_s14  ;;  %p900_p6 = scmp.lt.u32.totalorder %s896_s14, %s1379_s5 }
 0x1fc   :  { %p902_p7 = pnand %p900_p6, %p897_p5 }
 0x1fe   :  { %905 = shalt.err (!%p902_p7)
}
 0x1ff   :  { %579 = dma.vmem_to_hbm [thread:$0]  %s577_s10, 32, %s1379_s5, [#allocation3]  }
 0x200   :  { %906 = dma.done.wait [#allocation3], 32  }
 0x201   :  { %907 = vsyncadd [#allocation3], 4294967264 }
 0x202   :  { %583 = vsyncpa [#allocation3], 1 }

</bundles_post_ra>
